<compile_context>
chip_gen: v5e
topology: v5e:2x2
jax: 0.10.0
libtpu: 0.0.40
codegen_flags: <defaults>
</compile_context>

<pallas_src>
import math
import functools

import jax
import jax.numpy as jnp
from jax import lax
from jax.experimental import pallas as pl
from jax.experimental.pallas import tpu as pltpu


# ---------------------------------------------------------------------------
# Fused kernel: one grid step per batch element.
#   inputs : x (1,S,H), W_qkv (H,3H), b_qkv (1,3H), mask_bias (1,1,S)
#   outputs: ctx (1,S,H) [, probs (1,nH,S,S) when requested]
# ---------------------------------------------------------------------------
def _fused_self_attention_kernel(x_ref, w_ref, b_ref, bias_ref, ctx_ref,
                                 *probs_refs, num_heads, head_dim, exp_dtype):
    H = num_heads * head_dim
    S = x_ref.shape[1]

    x = x_ref[0]                                                      # (S, H)

    # Fused (S,H) x (H,3H) projection, f32 MXU accumulation, one bias add.
    # 1/sqrt(dH) is already folded into the Wq / bq columns by the wrapper.
    qkv = (jnp.dot(x, w_ref[...], preferred_element_type=jnp.float32)
           + b_ref[...]).astype(x.dtype)                              # (S, 3H)

    # Head-batched views: one relayout per tensor (vs 3*nH lane-offset slices).
    q_h = jnp.transpose(qkv[:, :H].reshape(S, num_heads, head_dim), (1, 0, 2))
    k_h = jnp.transpose(qkv[:, H:2 * H].reshape(S, num_heads, head_dim), (1, 0, 2))
    v_h = jnp.transpose(qkv[:, 2 * H:].reshape(S, num_heads, head_dim), (1, 0, 2))
    # q_h/k_h/v_h : (nH, S, dH)

    # Batched scores over all heads; f32 accumulation on the MXU.
    scores = jnp.einsum("hqd,hkd->hqk", q_h, k_h,
                        preferred_element_type=jnp.float32)           # (nH, S, S)
    # Additive mask bias: one broadcast/add over (nH, S, S) — not per head.
    scores = scores + bias_ref[0]                                     # (1,S) key-wise

    # Numerically-stable softmax with deferred normalization.
    m = jnp.max(scores, axis=-1, keepdims=True)                       # (nH, S, 1)
    e = jnp.exp((scores - m).astype(exp_dtype))                       # bf16 EUP on v6e/v7x
    denom = jnp.sum(e, axis=-1, keepdims=True, dtype=jnp.float32)     # f32 row sums
    inv = pl.reciprocal(denom, approx=True)                           # EUP reciprocal

    # Unnormalized P @ V batched over heads, then the deferred normalization
    # touches only (nH, S, dH) elements instead of (nH, S, S).
    ctx_h = jnp.einsum("hqk,hkd->hqd", e.astype(x.dtype), v_h,
                       preferred_element_type=jnp.float32)            # (nH, S, dH)
    ctx_h = ctx_h * inv

    # Merge heads; single lane-dense (S, H) store, already in (B, S, H) layout.
    ctx_ref[0] = jnp.transpose(ctx_h, (1, 0, 2)).reshape(S, H).astype(ctx_ref.dtype)

    # Optional attention-probs output (output_attentions=True path only).
    if probs_refs:
        probs_refs[0][0] = (e.astype(jnp.float32) * inv).astype(probs_refs[0].dtype)


# ---------------------------------------------------------------------------
# Parameter preparation — done ONCE (e.g. at init), not per forward call.
# ---------------------------------------------------------------------------
def prepare_qkv_params(params, num_heads, dtype=jnp.float32):
    """params = (wq, bq, wk, bk, wv, bv) with weights as (H_in, H_out).
    Returns (w_qkv (H,3H), b_qkv (1,3H)) with 1/sqrt(dH) folded into Wq/bq."""
    wq, bq, wk, bk, wv, bv = params
    H = wq.shape[0]
    if H % num_heads != 0:
        raise ValueError("hidden size %d not a multiple of num heads %d"
                         % (H, num_heads))
    scale = 1.0 / math.sqrt(H // num_heads)
    w_qkv = jnp.concatenate([wq * scale, wk, wv], axis=1).astype(dtype)     # (H, 3H)
    b_qkv = jnp.concatenate([bq * scale, bk, bv]).reshape(1, 3 * H).astype(jnp.float32)
    return w_qkv, b_qkv


def _vmem_budget_bytes(S, H, num_heads, in_dtype, exp_dtype, return_probs):
    """Rough per-grid-step working set, used to size vmem_limit_bytes."""
    isz = jnp.dtype(in_dtype).itemsize
    esz = jnp.dtype(exp_dtype).itemsize
    dH = H // num_heads
    ws = 0
    ws += 2 * S * H * isz                 # x block (double-buffered)
    ws += 2 * H * 3 * H * isz             # W_qkv (assume 2 buffers, worst case)
    ws += 2 * 3 * H * 4 + 2 * S * 4       # b_qkv + mask bias
    ws += 2 * S * H * isz                 # ctx output block
    ws += S * 3 * H * (4 + isz)           # qkv f32 accum + cast
    ws += 3 * num_heads * S * dH * isz    # head-split q/k/v relayouts
    ws += num_heads * S * S * (4 + esz + isz)   # scores + e + e cast
    ws += num_heads * S * dH * 4 + S * H * 4    # ctx_h f32 + merged ctx
    if return_probs:
        ws += 2 * num_heads * S * S * (4 + isz)  # probs compute + output block
    return ws


# ---------------------------------------------------------------------------
# Forward wrapper
# ---------------------------------------------------------------------------
def self_attention(hidden_states, qkv_params, attention_mask=None, num_heads=1,
                   return_probs=False, exp_dtype=None):
    """hidden_states: (B,S,H); qkv_params = prepare_qkv_params(...) output.
    Returns ctx (B,S,H) [and probs (B,nH,S,S) if return_probs]."""
    B, S, H = hidden_states.shape
    if H % num_heads != 0:
        raise ValueError("hidden size %d not a multiple of num heads %d"
                         % (H, num_heads))
    dH = H // num_heads
    w_qkv, b_qkv = qkv_params
    dtype = hidden_states.dtype

    # bf16 exp path only helps (and only exists) on v6e/v7x; with f32 inputs
    # keep everything f32 (also the right call on v5e).
    if exp_dtype is None:
        exp_dtype = jnp.bfloat16 if dtype == jnp.bfloat16 else jnp.float32

    # Additive mask bias computed once: (1 - mask) * -10000, shape (B, 1, S).
    if attention_mask is None:
        mask_bias = jnp.zeros((B, 1, S), jnp.float32)
    else:
        mask_bias = ((1.0 - attention_mask.astype(jnp.float32))
                     * (-10000.0)).reshape(B, 1, S)

    out_shapes = [jax.ShapeDtypeStruct((B, S, H), dtype)]
    out_specs = [pl.BlockSpec((1, S, H), lambda b: (b, 0, 0))]
    if return_probs:
        # Emit probs in the input dtype (halves VMEM/HBM for bf16 models).
        out_shapes.append(jax.ShapeDtypeStruct((B, num_heads, S, S), dtype))
        out_specs.append(pl.BlockSpec((1, num_heads, S, S), lambda b: (b, 0, 0, 0)))

    kernel = functools.partial(_fused_self_attention_kernel,
                               num_heads=num_heads, head_dim=dH,
                               exp_dtype=exp_dtype)

    vmem_limit = int(min(64 * 1024 * 1024,
                         max(16 * 1024 * 1024,
                             int(1.25 * _vmem_budget_bytes(
                                 S, H, num_heads, dtype, exp_dtype, return_probs)))))

    outs = pl.pallas_call(
        kernel,
        out_shape=tuple(out_shapes),
        grid_spec=pltpu.PrefetchScalarGridSpec(
            num_scalar_prefetch=0,
            grid=(B,),
            in_specs=[
                pl.BlockSpec((1, S, H), lambda b: (b, 0, 0)),        # x
                pl.BlockSpec((H, 3 * H), lambda b: (0, 0)),          # W_qkv (resident)
                pl.BlockSpec((1, 3 * H), lambda b: (0, 0)),          # b_qkv (resident)
                pl.BlockSpec((1, 1, S), lambda b: (b, 0, 0)),        # mask bias
            ],
            out_specs=out_specs,
        ),
        compiler_params=pltpu.CompilerParams(
            dimension_semantics=("parallel",),                        # megacore over B
            vmem_limit_bytes=vmem_limit),
    )(hidden_states, w_qkv, b_qkv, mask_bias)

    if return_probs:
        return outs[0], outs[1]
    return outs[0]


# ---------------------------------------------------------------------------
# Pure-JAX reference (mirrors the PyTorch forward, eval-mode dropout).
# ---------------------------------------------------------------------------
def _reference(hidden_states, params, attention_mask, num_heads):
    B, S, H = hidden_states.shape
    dH = H // num_heads
    wq, bq, wk, bk, wv, bv = params
    q = hidden_states @ wq + bq
    k = hidden_states @ wk + bk
    v = hidden_states @ wv + bv

    def split(x):
        return x.reshape(B, S, num_heads, dH).transpose(0, 2, 1, 3)

    qh, kh, vh = split(q), split(k), split(v)
    scores = jnp.einsum("bhqd,bhkd->bhqk", qh, kh) / math.sqrt(dH)
    ext = (1.0 - attention_mask.astype(jnp.float32))[:, None, None, :] * -10000.0
    scores = scores + ext
    probs = jax.nn.softmax(scores, axis=-1)
    ctx = jnp.einsum("bhqk,bhkd->bhqd", probs, vh)
    return ctx.transpose(0, 2, 1, 3).reshape(B, S, H), probs


if __name__ == "__main__":
    B, S, H, NH = 2, 8, 32, 4

    key = jax.random.PRNGKey(0)
    k_x, k_wq, k_bq, k_wk, k_bk, k_wv, k_bv = jax.random.split(key, 7)
    w_scale = 1.0 / math.sqrt(H)
    params = (
        jax.random.normal(k_wq, (H, H), jnp.float32) * w_scale,
        jax.random.normal(k_bq, (H,), jnp.float32) * 0.02,
        jax.random.normal(k_wk, (H, H), jnp.float32) * w_scale,
        jax.random.normal(k_bk, (H,), jnp.float32) * 0.02,
        jax.random.normal(k_wv, (H, H), jnp.float32) * w_scale,
        jax.random.normal(k_bv, (H,), jnp.float32) * 0.02,
    )
    hidden_states = jax.random.normal(k_x, (B, S, H), jnp.float32)
    # padding mask: last two key positions of batch 1 are masked out
    attention_mask = jnp.ones((B, S), jnp.float32).at[1, -2:].set(0.0)

    # One-time parameter prep (fused QKV weight with folded 1/sqrt(dH)).
    qkv_params = prepare_qkv_params(params, NH, dtype=hidden_states.dtype)

    # Default path (output_attentions=False): context only, no S^2 writeback.
    context = self_attention(hidden_states, qkv_params, attention_mask, NH)
    jax.block_until_ready(context)

    # Optional path with attention probs (output_attentions=True).
    context2, probs = self_attention(hidden_states, qkv_params, attention_mask,
                                     NH, return_probs=True)
    jax.block_until_ready((context2, probs))

    ref_ctx, ref_probs = _reference(hidden_states, params, attention_mask, NH)
    assert jnp.allclose(context, ref_ctx, atol=2e-3, rtol=2e-3)
    assert jnp.allclose(context2, ref_ctx, atol=2e-3, rtol=2e-3)
    assert jnp.allclose(probs, ref_probs, atol=2e-3, rtol=2e-3)

    print("KERNEL_OK")
</pallas_src>

<mosaic_0001>
module attributes {stable_mosaic.version = 11 : i64} {
  func.func @_fused_self_attention_kernel(%arg0: i32, %arg1: memref<1x8x32xf32, #tpu.memory_space<vmem>>, %arg2: memref<32x96xf32, #tpu.memory_space<vmem>>, %arg3: memref<1x96xf32, #tpu.memory_space<vmem>>, %arg4: memref<1x1x8xf32, #tpu.memory_space<vmem>>, %arg5: memref<1x8x32xf32, #tpu.memory_space<vmem>>) attributes {dimension_semantics = [#tpu.dimension_semantics<parallel>], iteration_bounds = array<i64: 2>, scalar_prefetch = 0 : i64, scratch_operands = 0 : i64, tpu.core_type = #tpu.core_type<tc>, window_params = [{transform_indices = @transform_0, window_bounds = array<i64: 1, 8, 32>}, {pipeline_mode = #tpu.pipeline_mode<synchronous>, transform_indices = @transform_1, window_bounds = array<i64: 32, 96>}, {pipeline_mode = #tpu.pipeline_mode<synchronous>, transform_indices = @transform_2, window_bounds = array<i64: 1, 96>}, {transform_indices = @transform_3, window_bounds = array<i64: 1, 1, 8>}, {transform_indices = @transform_4, window_bounds = array<i64: 1, 8, 32>}]} {
    %c0 = arith.constant 0 : index
    %c0_0 = arith.constant 0 : index
    %c0_1 = arith.constant 0 : index
    %0 = vector.load %arg1[%c0, %c0_0, %c0_1] : memref<1x8x32xf32, #tpu.memory_space<vmem>>, vector<1x8x32xf32>
    %1 = vector.shape_cast %0 : vector<1x8x32xf32> to vector<8x32xf32>
    %c0_2 = arith.constant 0 : index
    %c0_3 = arith.constant 0 : index
    %2 = vector.load %arg2[%c0_2, %c0_3] : memref<32x96xf32, #tpu.memory_space<vmem>>, vector<32x96xf32>
    %cst = arith.constant dense<0.000000e+00> : vector<8x96xf32>
    %3 = tpu.matmul %1, %2, %cst {dimension_numbers = #tpu.dot_dimension_numbers<[1], [0], [0], [1], [0, 0, 1, 1], [], []>} : vector<8x32xf32>, vector<32x96xf32>, vector<8x96xf32> -> vector<8x96xf32>
    %c0_4 = arith.constant 0 : index
    %c0_5 = arith.constant 0 : index
    %4 = vector.load %arg3[%c0_4, %c0_5] : memref<1x96xf32, #tpu.memory_space<vmem>>, vector<1x96xf32>
    %5 = vector.broadcast %4 : vector<1x96xf32> to vector<8x96xf32>
    %6 = arith.addf %3, %5 : vector<8x96xf32>
    %7 = vector.extract_strided_slice %6 {offsets = [0, 0], sizes = [8, 32], strides = [1, 1]} : vector<8x96xf32> to vector<8x32xf32>
    %8 = vector.shape_cast %7 : vector<8x32xf32> to vector<8x4x8xf32>
    %9 = tpu.transpose %8, [1, 0, 2] : vector<8x4x8xf32> -> vector<4x8x8xf32>
    %10 = vector.extract_strided_slice %6 {offsets = [0, 32], sizes = [8, 32], strides = [1, 1]} : vector<8x96xf32> to vector<8x32xf32>
    %11 = vector.shape_cast %10 : vector<8x32xf32> to vector<8x4x8xf32>
    %12 = tpu.transpose %11, [1, 0, 2] : vector<8x4x8xf32> -> vector<4x8x8xf32>
    %13 = vector.extract_strided_slice %6 {offsets = [0, 64], sizes = [8, 32], strides = [1, 1]} : vector<8x96xf32> to vector<8x32xf32>
    %14 = vector.shape_cast %13 : vector<8x32xf32> to vector<8x4x8xf32>
    %15 = tpu.transpose %14, [1, 0, 2] : vector<8x4x8xf32> -> vector<4x8x8xf32>
    "tpu.trace_start"() <{level = 10 : i32, message = "hqd,hkd->hqk"}> : () -> ()
    %cst_6 = arith.constant dense<0.000000e+00> : vector<4x8x8xf32>
    %16 = tpu.matmul %9, %12, %cst_6 {dimension_numbers = #tpu.dot_dimension_numbers<[2], [2], [1], [1], [0, 0, 0, 1, 1, 1], [0], [0]>} : vector<4x8x8xf32>, vector<4x8x8xf32>, vector<4x8x8xf32> -> vector<4x8x8xf32>
    "tpu.trace_stop"() : () -> ()
    %c0_7 = arith.constant 0 : index
    %c0_8 = arith.constant 0 : index
    %c0_9 = arith.constant 0 : index
    %17 = vector.load %arg4[%c0_7, %c0_8, %c0_9] : memref<1x1x8xf32, #tpu.memory_space<vmem>>, vector<1x1x8xf32>
    %18 = vector.shape_cast %17 : vector<1x1x8xf32> to vector<1x8xf32>
    %19 = vector.shape_cast %18 : vector<1x8xf32> to vector<1x1x8xf32>
    %20 = vector.broadcast %19 : vector<1x1x8xf32> to vector<4x8x8xf32>
    %21 = arith.addf %16, %20 : vector<4x8x8xf32>
    %cst_10 = arith.constant dense<0xFF800000> : vector<4x8xf32>
    %22 = vector.multi_reduction <maximumf>, %21, %cst_10 [2] : vector<4x8x8xf32> to vector<4x8xf32>
    %23 = vector.shape_cast %22 : vector<4x8xf32> to vector<4x8x1xf32>
    %24 = vector.broadcast %23 : vector<4x8x1xf32> to vector<4x8x8xf32>
    %25 = arith.subf %21, %24 : vector<4x8x8xf32>
    %26 = math.exp %25 : vector<4x8x8xf32>
    %cst_11 = arith.constant dense<0.000000e+00> : vector<4x8xf32>
    %27 = vector.multi_reduction <add>, %26, %cst_11 [2] : vector<4x8x8xf32> to vector<4x8xf32>
    %28 = vector.shape_cast %27 : vector<4x8xf32> to vector<4x8x1xf32>
    %29 = tpu.reciprocal %28 {approx = true} : vector<4x8x1xf32> -> vector<4x8x1xf32>
    "tpu.trace_start"() <{level = 10 : i32, message = "hqk,hkd->hqd"}> : () -> ()
    %cst_12 = arith.constant dense<0.000000e+00> : vector<4x8x8xf32>
    %30 = tpu.matmul %26, %15, %cst_12 {dimension_numbers = #tpu.dot_dimension_numbers<[2], [1], [1], [2], [0, 0, 0, 1, 1, 2], [0], [0]>} : vector<4x8x8xf32>, vector<4x8x8xf32>, vector<4x8x8xf32> -> vector<4x8x8xf32>
    "tpu.trace_stop"() : () -> ()
    %31 = vector.broadcast %29 : vector<4x8x1xf32> to vector<4x8x8xf32>
    %32 = arith.mulf %30, %31 : vector<4x8x8xf32>
    %33 = tpu.transpose %32, [1, 0, 2] : vector<4x8x8xf32> -> vector<8x4x8xf32>
    %34 = vector.shape_cast %33 : vector<8x4x8xf32> to vector<8x32xf32>
    %c0_13 = arith.constant 0 : index
    %c0_14 = arith.constant 0 : index
    %c0_15 = arith.constant 0 : index
    %35 = vector.load %arg5[%c0_13, %c0_14, %c0_15] : memref<1x8x32xf32, #tpu.memory_space<vmem>>, vector<1x8x32xf32>
    %36 = vector.shape_cast %35 : vector<1x8x32xf32> to vector<8x32xf32>
    %37 = vector.shape_cast %34 : vector<8x32xf32> to vector<1x8x32xf32>
    tpu.vector_store %arg5[%c0_13, %c0_14, %c0_15], %37 {strides = array<i32>} : memref<1x8x32xf32, #tpu.memory_space<vmem>>, vector<1x8x32xf32>,
    return
  }
  func.func @transform_0(%arg0: i32) -> (i32, i32, i32) {
    %c0_i32 = arith.constant 0 : i32
    %c0_i32_0 = arith.constant 0 : i32
    %c0_i32_1 = arith.constant 0 : i32
    return %arg0, %c0_i32, %c0_i32_0 : i32, i32, i32
  }
  func.func @transform_1(%arg0: i32) -> (i32, i32) {
    %c0_i32 = arith.constant 0 : i32
    %c0_i32_0 = arith.constant 0 : i32
    %c0_i32_1 = arith.constant 0 : i32
    return %c0_i32, %c0_i32_0 : i32, i32
  }
  func.func @transform_2(%arg0: i32) -> (i32, i32) {
    %c0_i32 = arith.constant 0 : i32
    %c0_i32_0 = arith.constant 0 : i32
    %c0_i32_1 = arith.constant 0 : i32
    return %c0_i32, %c0_i32_0 : i32, i32
  }
  func.func @transform_3(%arg0: i32) -> (i32, i32, i32) {
    %c0_i32 = arith.constant 0 : i32
    %c0_i32_0 = arith.constant 0 : i32
    %c0_i32_1 = arith.constant 0 : i32
    return %arg0, %c0_i32, %c0_i32_0 : i32, i32, i32
  }
  func.func @transform_4(%arg0: i32) -> (i32, i32, i32) {
    %c0_i32 = arith.constant 0 : i32
    %c0_i32_0 = arith.constant 0 : i32
    %c0_i32_1 = arith.constant 0 : i32
    return %arg0, %c0_i32, %c0_i32_0 : i32, i32, i32
  }
}

</mosaic_0001>

<bundles_post_ra>
// kernel: tpu_custom_call.1
= control target key start
LH: loop header
LB: loop body
LE: loop exit
PB: predicated region body
PF: predicated region fallthrough
CT: control target
= control target key end

     0   :  { %9 = vsyncpa [#allocation3], 0  ;;  %s1853_s0 = inlined_call_operand.hbm [shape: f32[2,8,32], index: 0, kind: input, shape index: {}]   ;;  %s1854_s1 = inlined_call_operand.hbm [shape: f32[32,96], index: 1, kind: input, shape index: {}]   ;;  %s1855_s2 = inlined_call_operand.hbm [shape: f32[1,96], index: 2, kind: input, shape index: {}]   ;;  %s1856_s3 = inlined_call_operand.vmem [shape: f32[2,1,8], index: 3, kind: input, shape index: {}]   ;;  %s1857_s4 = inlined_call_operand.hbm [shape: f32[2,8,32], index: 4, kind: output, shape index: {}]  }
   0x1   :  { %11 = vsyncpa [#allocation3 + $0x1], 0 }
   0x2   :  { %12 = vsyncpa [#allocation6], 0 }
   0x3   :  { %13 = vsyncpa [#allocation4], 0 }
   0x4   :  { %15 = vsyncpa [#allocation4 + $0x1], 0  ;;  %s1482_s15 = smov 0   ;;  %s1484_s16 = smov 0  }
   0x5   :  { %s1486_s17 = smov 0   ;;  %s1488_s18 = smov 0  }
   0x6 LB: > { %s157_s21 = sshll.u32 %s1854_s1, 4  ;;  %s1506_s22 = sadd.s32 4294967295, %s1441_s18   ;;  %s1441_s18 = sphi %s1488_s18, %s1868_s18   ;;  %s1437_s17 = sphi %s1486_s17, %s1867_s17   ;;  %s1433_s16 = sphi %s1484_s16, %s1866_s16   ;;  %s1429_s15 = sphi %s1482_s15, %s1865_s15   ;;  %s158_s21 = int_to_ptr.hbm [resolvable:$true] %s157_s21 }
   0x7   : > { %p1146_p0 = scmp.ge.s32.totalorder %s1441_s18, 1  ;;  %p42_p1 = scmp.eq.s32.totalorder %s1506_s22, 0 }
   0x8   : > { %p146_p2 = scmp.lt.s32.totalorder %s1441_s18, 3  ;;  %s1443_s24 = smov [#allocation5]  }
   0x9   : > { %s159_s25 = sshll.u32 %s1443_s24, 4  ;;  %s172_s28 = sshll.u32 %s1855_s2, 4  ;;  %s160_s25 = int_to_ptr.vmem [resolvable:$true] %s159_s25  ;;  %s173_s28 = int_to_ptr.hbm [resolvable:$true] %s172_s28 }
   0xa   : > { %p1511_p3 = pnand %p1146_p0, %p146_p2  ;;  %s1444_s29 = smov [#allocation7]  }
   0xb   : > { %s174_s30 = sshll.u32 %s1444_s29, 4  ;;  %s1445_s5 = smov 128   ;;  %s175_s30 = int_to_ptr.vmem [resolvable:$true] %s174_s30 }
   0xc   : > { %p1186_p4 = pneg %p1511_p3  ;;  %s1446_s6 = smov 8  }
   0xd   : > { %s1145_s7 = sadd.s32 4294967294, %s1441_s18   ;;  %s1525_s8 = sadd.s32 1, %s1441_s18  }
   0xe   : > { %p1187_p6 = pnand %p1186_p4, %p42_p1  ;;  %s25_s9 = ssub.s32 %s1441_s18, %s1525_s8 }
   0xf   : > { %s28_s10 = sadd.s32 1, %s1437_s17  ;;  %p26_p7 = scmp.eq.s32.totalorder %s25_s9, 0 }
  0x10   : > { %1189 = dma.hbm_to_vmem [thread:$0]  (!%p1187_p6), %s158_s21, 512, %s160_s25, [#allocation6], %s1445_s5, %s1445_s5, %s1446_s6  }
  0x11   : > { %1192 = dma.hbm_to_vmem [thread:$0]  (!%p1187_p6), %s173_s28, 16, %s175_s30, [#allocation6]  }
  0x12   : > { %p35_p8 = scmp.ne.s32.totalorder %s1437_s17, %s1433_s16  ;;  %p36_p9 = scmp.eq.s32.totalorder %s1441_s18, 0 }
  0x13   : > { %p41_p10 = scmp.ne.s32.totalorder %s1433_s16, %s1429_s15  ;;  %p133_p13 = scmp.eq.s32.totalorder %s1506_s22, 1 }
  0x14   : > { %s1536_s11 = scalar_select %p26_p7, %s1437_s17, %s28_s10  }
  0x15   : > { %p1538_p11 = por %p36_p9, %p35_p8  ;;  %p1544_p12 = por %p42_p1, %p41_p10 }
  0x16   : > { %p139_p0 = scmp.eq.s32.totalorder %s1145_s7, 1  ;;  %p1203_p2 = scmp.lt.s32.totalorder %s1441_s18, 2 }
  0x17   : > { %s185_s14 = sand.u32 1, %s1437_s17   ;;  %p1551_p4 = por %p133_p13, %p35_p8 }
  0x18   : > { %p1555_p6 = por %p139_p0, %p41_p10  ;;  %s1150_s21 = sshll.u32 %s185_s14, 3 }
  0x19   : > { %s1151_s24 = sshll.u32 %s1441_s18, 3  ;;  %s189_s28 = scalar_lea.vmem [#allocation2], %s1150_s21 }
  0x1a   : > { %s193_s27 = scalar_lea.hbm %s1853_s0, %s1151_s24  ;;  %s197_s29 = sshll.u32 %s189_s28, 4  ;;  %s198_s29 = int_to_ptr.vmem [resolvable:$true] %s197_s29 }
  0x1b   : > { %s195_s30 = sshll.u32 %s193_s27, 4  ;;  %p1565_p7 = pnand %p1203_p2, %p1538_p11  ;;  %s196_s30 = int_to_ptr.hbm [resolvable:$true] %s195_s30 }
  0x1c   : > { %s186_s6 = scalar_lea.sflag [#allocation3], %s185_s14  ;;  %s1341_s7 = sshra.s32 %s196_s30, 4  ;;  %s1342_s7 = int_to_ptr.hbm [resolvable:$true] %s1341_s7 }
  0x1d   : > { %s1343_s9 = scalar_lea.hbm %s1342_s7, 8  ;;  %p1345_p9 = pneg %p1565_p7 }
  0x1e   : > { %p1344_p8 = scmp.ne.s32.totalorder %s1342_s7, %s1343_s9  ;;  %s1348_s24 = scalar_lea.hbm %s1853_s0, 16 }
  0x1f   : > { %p1349_p11 = scmp.lt.s32.totalorder %s1342_s7, %s1853_s0  ;;  %p1350_p0 = scmp.lt.s32.totalorder %s1348_s24, %s1343_s9 }
  0x20   : > { %p1346_p10 = pnand %p1345_p9, %p1344_p8 }
  0x21   : > { %p1351_p2 = por %p1350_p0, %p1349_p11 }
  0x22   : > { %p1347_p13 = pneg %p1346_p10 }
  0x24   : > { %p1352_p5 = pnand %p1351_p2, %p1347_p13 }
  0x26   : > { %1355 = shalt.err (!%p1352_p5)
}
  0x27   : > { %1196 = dma.hbm_to_vmem [thread:$0]  (!%p1565_p7), %s196_s30, 128, %s198_s29, %s186_s6  }
  0x28   : > { %212 = sbr.rel (%p1511_p3) target bundleno = 989 (0x3dd), region = 36  ;;  %s1582_s14 = sand.u32 (!%p1511_p3), 1, %s1433_s16  }
  0x29   : > { %s1153_s26 = sshll.u32 (!%p1511_p3), %s1582_s14, 3  ;;  %s215_s27 = scalar_lea.sflag (!%p1511_p3), [#allocation3], %s1582_s14 }
  0x2a   : > { %s218_s28 = scalar_lea.vmem (!%p1511_p3), [#allocation2], %s1153_s26 }
  0x2d   : > { %1416 = dma.done.wait (%p1544_p12), %s215_s27, 128  }
  0x2e   : > { %1418 = vsyncadd (%p1544_p12), %s215_s27, 4294967168 }
  0x2f   : > { %1420 = dma.done.wait (%p42_p1), [#allocation6], 528  }
  0x30   : > { %1422 = vsyncadd (%p42_p1), [#allocation6], 4294966768  ;;  %v264_v0 = vld [vmem:[#allocation5 + $0x18] sm:$0xff]  ;;  %v263_v1 = vld [vmem:[#allocation5 + $0x10] sm:$0xff]  ;;  %vm269_vm0 = vcmask 261120   ;;  %s1447_s23 = smov 96  }
  0x31   : > { %285 = vmatpush.msra.mxu0 %v264_v0  ;;  %v262_v2 = vld [vmem:[#allocation5 + $0x8] sm:$0xff]  ;;  %v261_v3 = vld [vmem:[#allocation5] sm:$0xff]  ;;  %v260_v4 = vld [vmem:[%s218_s28] sm:$0xff]  ;;  %s1448_s13 = smov 120   ;;  %s1449_s29 = smov 112   ;;  %vm304_vm1 = vcmask 1047556  }
  0x32   : > { %v1263_v5 = vld [vmem:[#allocation7] ss:$0 sm:$0xff]  ;;  %s1450_s30 = smov 104   ;;  %s1451_s5 = smov 64   ;;  %v1452_v13 = vmov 1983009808  }
  0x33   : > { %286 = vmatpush.msra.mxu0 %v263_v1  ;;  %p257_p1 = scmp.lt.s32.totalorder %s1506_s22, 1  ;;  %v309_v14 = vunpack.c.l.s4 %v1452_v13  ;;  %v1453_v26 = vmov 1934713408   ;;  %vm662_vm2 = vcmask 64512   ;;  %s1454_s25 = smov 16   ;;  %vm1026_vm3 = vcmask 130048  }
  0x34   : > { %v333_v27 = vunpack.c.l.s4 %v1453_v26  ;;  %s1455_s12 = smov 24   ;;  %s1456_s27 = smov 8   ;;  %vm1028_vm4 = vcmask 195584  }
  0x35   : > { %287 = vmatpush.msra.mxu0 %v262_v2  ;;  %s1599_s6 = scalar_select %p257_p1, %s1506_s22, 1  ;;  %v1605_v17 = vunpack.c.0.s8 %v309_v14 }
  0x36   : > { %v1615_v32 = vunpack.c.0.s8 %v333_v27  ;;  %s1171_s28 = sshll.u32 %s1506_s22, 3  ;;  %s1032_s22 = scalar_lea.sflag [#allocation4], %s1582_s14 }
  0x37   : > { %288 = vmatpush.msra.mxu0 %v261_v3  ;;  %s259_s10 = scalar_lea.vmem %s1856_s3, %s1599_s6  ;;  %s1391_s21 = scalar_lea.hbm %s1857_s4, 16 }
  0x38   : > { %1157 = vmatmul.msk.f32.vlgmr.msra.gmra.mxu0 %vm269_vm0, %v260_v4 }
  0xb5   : > { %v290_v6 = vpop.f32.mrf.mxu0 }
  0xb6   : > { %v291_v7 = vadd.f32 %v1263_v5, %v290_v6 }
  0xb8   : > { %414 = vrot.lane.b32.xlu2 %v291_v7, %s1447_s23  ;;  %294 = vrot.lane.b32.xlu1 %v291_v7, %s1448_s13  ;;  %v306_v16 = vrot.slane %v291_v7, 4 }
  0xb9   : > { %297 = vrot.lane.b32.xlu0 %v291_v7, %s1449_s29  ;;  %s1042_s29 = scalar_lea.hbm %s1857_s4, %s1171_s28 }
  0xba   : > { %s1046_s6 = sshll.u32 %s1042_s29, 4  ;;  %s1047_s6 = int_to_ptr.hbm [resolvable:$true] %s1046_s6 }
  0xbb   : > { %s1385_s7 = sshra.s32 %s1047_s6, 4  ;;  %s1386_s7 = int_to_ptr.hbm [resolvable:$true] %s1385_s7 }
  0xbc   : > { %s1387_s9 = scalar_lea.hbm %s1386_s7, 8  ;;  %p1392_p7 = scmp.lt.s32.totalorder %s1386_s7, %s1857_s4 }
  0xbd   : > { %p1388_p3 = scmp.ne.s32.totalorder %s1386_s7, %s1387_s9  ;;  %p1393_p8 = scmp.lt.s32.totalorder %s1391_s21, %s1387_s9 }
  0xbf   : > { %p1389_p5 = pnand %p1388_p3, %p1551_p4  ;;  %p1394_p9 = por %p1393_p8, %p1392_p7 }
  0xc1   : > { %300 = vrot.lane.b32.xlu0 %v291_v7, %s1450_s30  ;;  %s256_s30 = scalar_lea.vmem [#allocation8], %s1153_s26  ;;  %p1390_p12 = pneg %p1389_p5 }
  0xc3   : > { %p1395_p10 = pnand %p1394_p9, %p1390_p12 }
 0x112   : > { %v415_v49 = vpop.permute.xlu2 %414 }
 0x113   : > { %v428_v4 = vrot.slane %v415_v49, 4 }
 0x12a   : > { %v295_v8 = vpop.permute.xlu1 %294 }
 0x12b   : > { %v298_v9 = vpop.permute.xlu0 %297  ;;  %416 = vrot.lane.b32.xlu0 %v295_v8, %s1447_s23  ;;  %v1253_v10 = vpack.i.bf16 %v295_v8, %v291_v7  ;;  %v318_v19 = vrot.slane %v295_v8, 4 }
 0x12c   : > { %418 = vrot.lane.b32.xlu1 %v298_v9, %s1447_s23  ;;  %v303_v15 = vrot.slane %v298_v9, 4  ;;  %v307_v20 = vsel %vm304_vm1, %v298_v9, %v306_v16 }
 0x12d   : > { %v315_v23 = vperm.slane %v307_v20, %v1605_v17 }
 0x12e   : > { %v305_v21 = vsel %vm304_vm1, %v303_v15, %v291_v7 }
 0x12f   : > { %v311_v25 = vperm.slane %v305_v21, %v1605_v17  ;;  %v342_v30 = vrot.slane %v315_v23, 4 }
 0x131   : > { %v330_v31 = vrot.slane %v311_v25, 4 }
 0x133   : > { %v301_v11 = vpop.permute.xlu0 %300 }
 0x134   : > { %1254 = vrot.lane.b32.xlu1 %v1253_v10, %s1451_s5  ;;  %420 = vrot.lane.b32.xlu2 %v301_v11, %s1447_s23  ;;  %v1258_v12 = vpack.i.bf16 %v301_v11, %v298_v9  ;;  %v316_v18 = vrot.slane %v301_v11, 4  ;;  %v319_v22 = vsel %vm304_vm1, %v301_v11, %v318_v19 }
 0x135   : > { %v327_v28 = vperm.slane %v319_v22, %v1605_v17 }
 0x136   : > { %v317_v24 = vsel %vm304_vm1, %v316_v18, %v295_v8 }
 0x137   : > { %v323_v29 = vperm.slane %v317_v24, %v1605_v17  ;;  %v340_v33 = vrot.slane %v327_v28, 4  ;;  %v343_v34 = vsel %vm304_vm1, %v327_v28, %v342_v30 }
 0x138   : > { %v351_v37 = vperm.slane %v343_v34, %v1615_v32 }
 0x139   : > { %v328_v35 = vrot.slane %v323_v29, 4  ;;  %v331_v36 = vsel %vm304_vm1, %v323_v29, %v330_v31  ;;  %v341_v39 = vsel %vm304_vm1, %v340_v33, %v315_v23 }
 0x13a   : > { %v339_v38 = vperm.slane %v331_v36, %v1615_v32  ;;  %v347_v41 = vperm.slane %v341_v39, %v1615_v32  ;;  %v358_v42 = vrot.slane %v351_v37, 4 }
 0x13b   : > { %v329_v40 = vsel %vm304_vm1, %v328_v35, %v311_v25 }
 0x13c   : > { %1259 = vrot.lane.b32.xlu2 %v1258_v12, %s1451_s5  ;;  %v335_v43 = vperm.slane %v329_v40, %v1615_v32  ;;  %v354_v44 = vrot.slane %v339_v38, 4  ;;  %v356_v45 = vrot.slane %v347_v41, 4  ;;  %v359_v46 = vsel %vm304_vm1, 0.0, %v358_v42  ;;  %s1044_s5 = sshll.u32 %s256_s30, 4  ;;  %s1045_s5 = int_to_ptr.vmem [resolvable:$true] %s1044_s5 }
 0x13d   : > { %v376_v50 = vrot.slane %v359_v46, 4  ;;  %v371_v54 = vsel %vm304_vm1, %v358_v42, %v347_v41 }
 0x13e   : > { %v352_v47 = vrot.slane %v335_v43, 4  ;;  %v355_v48 = vsel %vm304_vm1, 0.0, %v354_v44  ;;  %v357_v51 = vsel %vm304_vm1, 0.0, %v356_v45  ;;  %v360_v57 = vsel %vm304_vm1, %v354_v44, %v335_v43 }
 0x13f   : > { %v365_v52 = vrot.slane %v355_v48, 4  ;;  %v377_v55 = vsel %vm304_vm1, %v376_v50, %v357_v51  ;;  %v375_v59 = vperm.slane %v371_v54, %v1605_v17  ;;  %v364_v62 = vperm.slane %v360_v57, %v1605_v17 }
 0x140   : > { %v353_v53 = vsel %vm304_vm1, 0.0, %v352_v47  ;;  %v381_v60 = vperm.slane %v377_v55, %v1605_v17 }
 0x141   : > { %v366_v56 = vsel %vm304_vm1, %v365_v52, %v353_v53  ;;  %v396_v63 = vrot.slane %v375_v59, 4  ;;  %v384_v3 = vrot.slane %v364_v62, 4 }
 0x142   : > { %v370_v61 = vperm.slane %v366_v56, %v1605_v17  ;;  %v394_v0 = vrot.slane %v381_v60, 4 }
 0x143   : > { %v397_v9 = vsel %vm304_vm1, %v381_v60, %v396_v63 }
 0x144   : > { %v382_v1 = vrot.slane %v370_v61, 4  ;;  %v395_v10 = vsel %vm304_vm1, %v394_v0, %v375_v59  ;;  %v385_v19 = vsel %vm304_vm1, %v370_v61, %v384_v3  ;;  %v1649_v23 = vperm.slane %v397_v9, %v1615_v32 }
 0x145   : > { %v1656_v27 = vperm.slane %v395_v10, %v1615_v32  ;;  %v1659_v30 = vperm.slane %v385_v19, %v1615_v32 }
 0x146   : > { %v383_v14 = vsel %vm304_vm1, %v382_v1, %v364_v62  ;;  %v410_v39 = vrot.slane %v1649_v23, 4 }
 0x147   : > { %v1653_v26 = vperm.slane %v383_v14, %v1615_v32  ;;  %v406_v43 = vrot.slane %v1656_v27, 4 }
 0x149   : > { %v408_v44 = vrot.slane %v1653_v26, 4 }
 0x18e   : > { %v421_v58 = vpop.permute.xlu2 %420 }
 0x18f   : > { %v438_v2 = vrot.slane %v421_v58, 4 }
 0x196   : > { %v1260_v15 = vpop.permute.xlu2 %1259 }
 0x197   : > { %v1262_v28 = vunpack.i.h.bf16 %v1260_v15  ;;  %v1261_v31 = vunpack.i.l.bf16 %v1260_v15 }
 0x199   : > { %v560_v45 = vrot.slane %v1262_v28, 4 }
 0x19d   : > { %v417_v5 = vpop.permute.xlu0 %416 }
 0x19e   : > { %v419_v6 = vpop.permute.xlu1 %418  ;;  %v439_v7 = vsel %vm304_vm1, %v438_v2, %v417_v5  ;;  %v440_v8 = vrot.slane %v417_v5, 4 }
 0x19f   : > { %v426_v11 = vrot.slane %v419_v6, 4  ;;  %v429_v12 = vsel %vm304_vm1, %v419_v6, %v428_v4  ;;  %v445_v13 = vperm.slane %v439_v7, %v1605_v17 }
 0x1a0   : > { %v437_v16 = vperm.slane %v429_v12, %v1605_v17  ;;  %v441_v18 = vsel %vm304_vm1, %v421_v58, %v440_v8 }
 0x1a1   : > { %v427_v20 = vsel %vm304_vm1, %v426_v11, %v415_v49  ;;  %v449_v21 = vperm.slane %v441_v18, %v1605_v17  ;;  %v450_v22 = vrot.slane %v445_v13, 4  ;;  %v548_v49 = vrot.slane %v1261_v31, 4 }
 0x1a2   : > { %v433_v24 = vperm.slane %v427_v20, %v1605_v17  ;;  %v464_v25 = vrot.slane %v437_v16, 4 }
 0x1a3   : > { %v462_v29 = vrot.slane %v449_v21, 4 }
 0x1a4   : > { %v452_v33 = vrot.slane %v433_v24, 4  ;;  %v451_v34 = vsel %vm304_vm1, %v450_v22, %v433_v24  ;;  %v465_v35 = vsel %vm304_vm1, %v449_v21, %v464_v25 }
 0x1a5   : > { %v457_v36 = vperm.slane %v451_v34, %v1615_v32  ;;  %v463_v37 = vsel %vm304_vm1, %v462_v29, %v437_v16  ;;  %v473_v38 = vperm.slane %v465_v35, %v1615_v32 }
 0x1a6   : > { %v453_v40 = vsel %vm304_vm1, %v445_v13, %v452_v33  ;;  %v469_v41 = vperm.slane %v463_v37, %v1615_v32  ;;  %v1255_v42 = vpop.permute.xlu1 %1254 }
 0x1a7   : > { %v461_v46 = vperm.slane %v453_v40, %v1615_v32  ;;  %v480_v47 = vrot.slane %v473_v38, 4  ;;  %v1257_v48 = vunpack.i.h.bf16 %v1255_v42  ;;  %v474_v50 = vrot.slane %v457_v36, 4 }
 0x1a8   : > { %v478_v51 = vrot.slane %v469_v41, 4  ;;  %v1256_v52 = vunpack.i.l.bf16 %v1255_v42 }
 0x1a9   : > { %v476_v53 = vrot.slane %v461_v46, 4  ;;  %v481_v54 = vsel %vm304_vm1, 0.0, %v480_v47  ;;  %v562_v55 = vrot.slane %v1257_v48, 4  ;;  %v561_v56 = vsel %vm304_vm1, %v560_v45, %v1257_v48 }
 0x1aa   : > { %v498_v57 = vrot.slane %v481_v54, 4  ;;  %v549_v58 = vsel %vm304_vm1, %v548_v49, %v1256_v52  ;;  %v550_v59 = vrot.slane %v1256_v52, 4  ;;  %v567_v60 = vperm.slane %v561_v56, %v1605_v17 }
 0x1ab   : > { %v477_v61 = vsel %vm304_vm1, 0.0, %v476_v53  ;;  %v482_v62 = vsel %vm304_vm1, %v476_v53, %v457_v36  ;;  %v555_v63 = vperm.slane %v549_v58, %v1605_v17  ;;  %v563_v0 = vsel %vm304_vm1, %v1262_v28, %v562_v55 }
 0x1ac   : > { %v487_v1 = vrot.slane %v477_v61, 4  ;;  %v551_v2 = vsel %vm304_vm1, %v1261_v31, %v550_v59  ;;  %v571_v3 = vperm.slane %v563_v0, %v1605_v17  ;;  %v572_v4 = vrot.slane %v567_v60, 4 }
 0x1ad   : > { %v559_v5 = vperm.slane %v551_v2, %v1605_v17  ;;  %v574_v6 = vrot.slane %v555_v63, 4  ;;  %v475_v7 = vsel %vm304_vm1, 0.0, %v474_v50  ;;  %v479_v8 = vsel %vm304_vm1, 0.0, %v478_v51 }
 0x1ae   : > { %v573_v9 = vsel %vm304_vm1, %v572_v4, %v555_v63  ;;  %v584_v10 = vrot.slane %v571_v3, 4  ;;  %v486_v11 = vperm.slane %v482_v62, %v1605_v17  ;;  %v488_v12 = vsel %vm304_vm1, %v487_v1, %v475_v7 }
 0x1af   : > { %v575_v13 = vsel %vm304_vm1, %v567_v60, %v574_v6  ;;  %v579_v14 = vperm.slane %v573_v9, %v1615_v32  ;;  %v586_v15 = vrot.slane %v559_v5, 4  ;;  %v492_v16 = vperm.slane %v488_v12, %v1605_v17 }
 0x1b0   : > { %v583_v18 = vperm.slane %v575_v13, %v1615_v32  ;;  %v585_v19 = vsel %vm304_vm1, %v584_v10, %v559_v5  ;;  %v493_v20 = vsel %vm304_vm1, %v480_v47, %v469_v41  ;;  %v499_v21 = vsel %vm304_vm1, %v498_v57, %v479_v8 }
 0x1b1   : > { %v587_v22 = vsel %vm304_vm1, %v571_v3, %v586_v15  ;;  %v591_v24 = vperm.slane %v585_v19, %v1615_v32  ;;  %v497_v25 = vperm.slane %v493_v20, %v1605_v17  ;;  %v503_v31 = vperm.slane %v499_v21, %v1605_v17 }
 0x1b2   : > { %v595_v28 = vperm.slane %v587_v22, %v1615_v32  ;;  %v598_v29 = vrot.slane %v583_v18, 4  ;;  %v506_v33 = vrot.slane %v486_v11, 4  ;;  %v596_v34 = vrot.slane %v579_v14, 4 }
 0x1b3   : > { %v600_v35 = vrot.slane %v591_v24, 4  ;;  %v518_v36 = vrot.slane %v497_v25, 4  ;;  %v504_v37 = vrot.slane %v492_v16, 4  ;;  %v516_v52 = vrot.slane %v503_v31, 4 }
 0x1b4   : > { %v599_v38 = vsel %vm304_vm1, 0.0, %v598_v29  ;;  %v602_v40 = vrot.slane %v595_v28, 4  ;;  %v604_v41 = vsel %vm304_vm1, %v598_v29, %v579_v14  ;;  %v507_v42 = vsel %vm304_vm1, %v492_v16, %v506_v33 }
 0x1b5   : > { %v609_v45 = vrot.slane %v599_v38, 4  ;;  %v515_v46 = vperm.slane %v507_v42, %v1615_v32  ;;  %v519_v47 = vsel %vm304_vm1, %v503_v31, %v518_v36  ;;  %v505_v48 = vsel %vm304_vm1, %v504_v37, %v486_v11 }
 0x1b6   : > { %v603_v49 = vsel %vm304_vm1, 0.0, %v602_v40  ;;  %v527_v50 = vperm.slane %v519_v47, %v1615_v32  ;;  %v511_v51 = vperm.slane %v505_v48, %v1615_v32  ;;  %v597_v53 = vsel %vm304_vm1, 0.0, %v596_v34 }
 0x1b7   : > { %v620_v54 = vrot.slane %v603_v49, 4  ;;  %v534_v55 = vrot.slane %v515_v46, 4  ;;  %v608_v56 = vperm.slane %v604_v41, %v1605_v17  ;;  %v517_v58 = vsel %vm304_vm1, %v516_v52, %v497_v25 }
 0x1b8   : > { %v532_v57 = vrot.slane %v527_v50, 4  ;;  %v530_v59 = vrot.slane %v511_v51, 4  ;;  %v610_v60 = vsel %vm304_vm1, %v609_v45, %v597_v53  ;;  %v523_v61 = vperm.slane %v517_v58, %v1615_v32 }
 0x1b9   : > { %v601_v62 = vsel %vm304_vm1, 0.0, %v600_v35  ;;  %v614_v63 = vperm.slane %v610_v60, %v1605_v17  ;;  %v615_v0 = vsel %vm304_vm1, %v602_v40, %v591_v24  ;;  %v628_v4 = vrot.slane %v608_v56, 4  ;;  %v1264_v35 = vld [vmem:[%s259_s10] ss:$0 sm:$0xff] }
 0x1ba   : > { %v533_v1 = vsel %vm304_vm1, %v532_v57, %v515_v46  ;;  %v619_v2 = vperm.slane %v615_v0, %v1605_v17  ;;  %v621_v3 = vsel %vm304_vm1, %v620_v54, %v601_v62  ;;  %v528_v5 = vrot.slane %v523_v61, 4 }
 0x1bb   : > { %1162 = vmatpush.xpose.msk.msra.mxu3 %vm662_vm2, %v533_v1  ;;  %v531_v6 = vsel %vm304_vm1, %v523_v61, %v530_v59  ;;  %v625_v7 = vperm.slane %v621_v3, %v1605_v17  ;;  %v626_v8 = vrot.slane %v614_v63, 4  ;;  %v411_v9 = vsel %vm304_vm1, %v410_v39, %v1659_v30 }
 0x1bc   : > { %v535_v10 = vsel %vm304_vm1, %v527_v50, %v534_v55  ;;  %1160 = vmatpush.xpose.msk.msra.mxu2 %vm662_vm2, %v531_v6  ;;  %v629_v11 = vsel %vm304_vm1, %v614_v63, %v628_v4  ;;  %v640_v12 = vrot.slane %v619_v2, 4  ;;  %v529_v13 = vsel %vm304_vm1, %v528_v5, %v511_v51 }
 0x1bd   : > { %v637_v14 = vperm.slane %v629_v11, %v1615_v32  ;;  %v627_v15 = vsel %vm304_vm1, %v626_v8, %v608_v56  ;;  %v638_v16 = vrot.slane %v625_v7, 4  ;;  %1158 = vmatpush.xpose.msk.msra.mxu1 %vm662_vm2, %v529_v13  ;;  %v409_v39 = vsel %vm304_vm1, %v1656_v27, %v408_v44 }
 0x1be   : > { %1163 = vmatmul.msk.f32.vlgmr.msra.gmra.mxu3 %vm662_vm2, %v411_v9  ;;  %v641_v18 = vsel %vm304_vm1, %v625_v7, %v640_v12  ;;  %v633_v19 = vperm.slane %v627_v15, %v1615_v32  ;;  %v407_v24 = vsel %vm304_vm1, %v406_v43, %v1653_v26  ;;  %v412_v27 = vrot.slane %v1659_v30, 4 }
 0x1bf   : > { %1161 = vmatmul.msk.f32.vlgmr.msra.gmra.mxu2 %vm662_vm2, %v409_v39  ;;  %v649_v20 = vperm.slane %v641_v18, %v1615_v32  ;;  %v656_v21 = vrot.slane %v637_v14, 4  ;;  %v639_v22 = vsel %vm304_vm1, %v638_v16, %v619_v2 }
 0x1c0   : > { %v645_v44 = vperm.slane %v639_v22, %v1615_v32  ;;  %v652_v25 = vrot.slane %v633_v19, 4  ;;  %1159 = vmatmul.msk.f32.vlgmr.msra.gmra.mxu1 %vm662_vm2, %v407_v24  ;;  %v413_v43 = vsel %vm304_vm1, %v1649_v23, %v412_v27 }
 0x1c1   : > { %1164 = vmatpush.xpose.msk.msrb.mxu1 %vm662_vm2, %v535_v10  ;;  %v657_v28 = vsel %vm304_vm1, %v649_v20, %v656_v21  ;;  %v654_v29 = vrot.slane %v649_v20, 4 }
 0x1c2   : > { %v653_v31 = vsel %vm304_vm1, %v645_v44, %v652_v25  ;;  %v650_v33 = vrot.slane %v645_v44, 4 }
 0x1c3   : > { %848 = vmatpush.msrb.mxu3 %v653_v31  ;;  %v655_v34 = vsel %vm304_vm1, %v654_v29, %v637_v14 }
 0x1c4   : > { %871 = vmatpush.msrb.mxu0 %v655_v34  ;;  %v651_v26 = vsel %vm304_vm1, %v650_v33, %v633_v19 }
 0x1c5   : > { %894 = vmatpush.msra.mxu1 %v657_v28  ;;  %825 = vmatpush.msrb.mxu2 %v651_v26 }
 0x1c8   : > { %1165 = vmatmul.msk.f32.vlgmr.msrb.gmra.mxu1 %vm662_vm2, %v413_v43 }
 0x23d   : > { %v686_v36 = vpop.f32.mrf.mxu1 }
 0x23e   : > { %v687_v37 = vadd.f32 %v1264_v35, %v686_v36 }
 0x240   : > { %v767_v40 = vsel %vm662_vm2, %v687_v37, -inf }
 0x241   : > { %v738_v38 = vpop.f32.mrf.mxu3  ;;  %768 = vmax.xlane.f32.xlu0 %v767_v40 }
 0x242   : > { %v739_v41 = vadd.f32 %v1264_v35, %v738_v38  ;;  %v712_v30 = vpop.f32.mrf.mxu2 }
 0x243   : > { %v713_v42 = vadd.f32 %v1264_v35, %v712_v30 }
 0x244   : > { %v773_v45 = vsel %vm662_vm2, %v739_v41, -inf }
 0x245   : > { %774 = vmax.xlane.f32.xlu2 %v773_v45  ;;  %v770_v23 = vsel %vm662_vm2, %v713_v42, -inf  ;;  %v764_v46 = vpop.f32.mrf.mxu1 }
 0x246   : > { %771 = vmax.xlane.f32.xlu1 %v770_v23  ;;  %v765_v47 = vadd.f32 %v1264_v35, %v764_v46 }
 0x248   : > { %v776_v48 = vsel %vm662_vm2, %v765_v47, -inf }
 0x24d   : > { %777 = vmax.xlane.f32.xlu2 %v776_v48 }
 0x2b4   : > { %v769_v49 = vpop.xlane.xlu0 %768 }
 0x2b5   : > { %v779_v50 = vsub.f32 %v687_v37, %v769_v49 }
 0x2b7   : > { %v783_v51 = vmul.f32 1.442695, %v779_v50 }
 0x2b8   : > { %v775_v52 = vpop.xlane.xlu2 %774 }
 0x2b9   : > { %v781_v53 = vsub.f32 %v739_v41, %v775_v52  ;;  %v772_v54 = vpop.xlane.xlu1 %771  ;;  %1265 = vpow2.f32 %v783_v51 }
 0x2ba   : > { %v780_v55 = vsub.f32 %v713_v42, %v772_v54 }
 0x2bb   : > { %v787_v56 = vmul.f32 1.442695, %v781_v53 }
 0x2bc   : > { %v785_v57 = vmul.f32 1.442695, %v780_v55 }
 0x2bd   : > { %1267 = vpow2.f32 %v787_v56 }
 0x2be   : > { %1269 = vpow2.f32 %v785_v57 }
 0x2bf   : > { %v1266_v58 = vpop.eup %1265 }
 0x2c0   : > { %v778_v59 = vpop.xlane.xlu2 %777  ;;  %1166 = vmatmul.msk.f32.vlgmr.msrb.gmra.mxu2 %vm662_vm2, %v1266_v58  ;;  %v791_v61 = vsel %vm662_vm2, %v1266_v58, 0.0 }
 0x2c1   : > { %v782_v60 = vsub.f32 %v765_v47, %v778_v59  ;;  %792 = vadd.xlane.f32.xlu1 %v791_v61 }
 0x2c3   : > { %v1268_v62 = vpop.eup %1267  ;;  %v789_v63 = vmul.f32 1.442695, %v782_v60 }
 0x2c4   : > { %v1270_v0 = vpop.eup %1269  ;;  %1168 = vmatmul.msk.f32.vlgmr.msrb.gmra.mxu0 %vm662_vm2, %v1268_v62  ;;  %v797_v1 = vsel %vm662_vm2, %v1268_v62, 0.0 }
 0x2c5   : > { %1271 = vpow2.f32 %v789_v63  ;;  %798 = vadd.xlane.f32.xlu0 %v797_v1  ;;  %1167 = vmatmul.msk.f32.vlgmr.msrb.gmra.mxu3 %vm662_vm2, %v1270_v0  ;;  %v794_v4 = vsel %vm662_vm2, %v1270_v0, 0.0 }
 0x2cb   : > { %v1272_v2 = vpop.eup %1271 }
 0x2cc   : > { %1169 = vmatmul.msk.f32.vlgmr.msra.gmra.mxu1 %vm662_vm2, %v1272_v2  ;;  %v800_v3 = vsel %vm662_vm2, %v1272_v2, 0.0 }
 0x2cd   : > { %801 = vadd.xlane.f32.xlu2 %v800_v3  ;;  %795 = vadd.xlane.f32.xlu0 %v794_v4 }
 0x334   : > { %v793_v6 = vpop.xlane.xlu1 %792 }
 0x338   : > { %v799_v5 = vpop.xlane.xlu0 %798 }
 0x339   : > { %1273 = vrcp.f32 %v799_v5 }
 0x33a   : > { %1275 = vrcp.f32 %v793_v6 }
 0x33f   : > { %v1274_v9 = vpop.eup %1273 }
 0x340   : > { %v802_v7 = vpop.xlane.xlu2 %801  ;;  %v796_v8 = vpop.xlane.xlu0 %795 }
 0x341   : > { %v873_v10 = vpop.f32.mrf.mxu0  ;;  %1277 = vrcp.f32 %v796_v8  ;;  %v1276_v12 = vpop.eup %1275 }
 0x342   : > { %v901_v11 = vmul.f32 %v1274_v9, %v873_v10  ;;  %1279 = vrcp.f32 %v802_v7 }
 0x343   : > { %v827_v14 = vpop.f32.mrf.mxu2 }
 0x344   : > { %v903_v13 = vrot.slane %v901_v11, 4  ;;  %v899_v15 = vmul.f32 %v1276_v12, %v827_v14 }
 0x346   : > { %v905_v16 = vrot.slane %v899_v15, 4  ;;  %v904_v18 = vsel %vm304_vm1, %v903_v13, %v899_v15 }
 0x347   : > { %v1278_v39 = vpop.eup %1277  ;;  %v910_v28 = vperm.slane %v904_v18, %v1605_v17 }
 0x348   : > { %v850_v19 = vpop.f32.mrf.mxu3  ;;  %v1280_v20 = vpop.eup %1279  ;;  %v906_v21 = vsel %vm304_vm1, %v901_v11, %v905_v16 }
 0x349   : > { %v896_v22 = vpop.f32.mrf.mxu1  ;;  %v900_v24 = vmul.f32 %v1278_v39, %v850_v19  ;;  %v914_v44 = vperm.slane %v906_v21, %v1605_v17  ;;  %v929_v43 = vrot.slane %v910_v28, 4 }
 0x34a   : > { %v902_v25 = vmul.f32 %v1280_v20, %v896_v22 }
 0x34b   : > { %v917_v29 = vrot.slane %v900_v24, 4  ;;  %v941_v34 = vrot.slane %v914_v44, 4 }
 0x34c   : > { %v915_v31 = vrot.slane %v902_v25, 4 }
 0x34d   : > { %v918_v33 = vsel %vm304_vm1, %v902_v25, %v917_v29 }
 0x34e   : > { %v916_v27 = vsel %vm304_vm1, %v915_v31, %v900_v24  ;;  %v926_v26 = vperm.slane %v918_v33, %v1605_v17 }
 0x34f   : > { %v922_v35 = vperm.slane %v916_v27, %v1605_v17 }
 0x350   : > { %v939_v36 = vrot.slane %v926_v26, 4  ;;  %v942_v37 = vsel %vm304_vm1, %v926_v26, %v941_v34 }
 0x351   : > { %v927_v38 = vrot.slane %v922_v35, 4  ;;  %v930_v40 = vsel %vm304_vm1, %v922_v35, %v929_v43  ;;  %v950_v41 = vperm.slane %v942_v37, %v1615_v32 }
 0x352   : > { %v938_v30 = vperm.slane %v930_v40, %v1615_v32  ;;  %v940_v42 = vsel %vm304_vm1, %v939_v36, %v914_v44 }
 0x353   : > { %v928_v45 = vsel %vm304_vm1, %v927_v38, %v910_v28  ;;  %v946_v23 = vperm.slane %v940_v42, %v1615_v32  ;;  %v957_v46 = vrot.slane %v950_v41, 4 }
 0x354   : > { %v934_v47 = vperm.slane %v928_v45, %v1615_v32  ;;  %v953_v48 = vrot.slane %v938_v30, 4 }
 0x355   : > { %v958_v49 = vsel %vm304_vm1, 0.0, %v957_v46  ;;  %v955_v50 = vrot.slane %v946_v23, 4  ;;  %v970_v51 = vsel %vm304_vm1, %v957_v46, %v946_v23 }
 0x356   : > { %v951_v52 = vrot.slane %v934_v47, 4  ;;  %v954_v53 = vsel %vm304_vm1, 0.0, %v953_v48  ;;  %v959_v54 = vsel %vm304_vm1, %v953_v48, %v934_v47  ;;  %v975_v55 = vrot.slane %v958_v49, 4 }
 0x357   : > { %v964_v56 = vrot.slane %v954_v53, 4  ;;  %v956_v57 = vsel %vm304_vm1, 0.0, %v955_v50  ;;  %v963_v58 = vperm.slane %v959_v54, %v1605_v17  ;;  %v974_v59 = vperm.slane %v970_v51, %v1605_v17 }
 0x358   : > { %v952_v60 = vsel %vm304_vm1, 0.0, %v951_v52  ;;  %v976_v61 = vsel %vm304_vm1, %v975_v55, %v956_v57 }
 0x359   : > { %v965_v62 = vsel %vm304_vm1, %v964_v56, %v952_v60  ;;  %v980_v63 = vperm.slane %v976_v61, %v1605_v17  ;;  %v983_v0 = vrot.slane %v963_v58, 4  ;;  %v995_v1 = vrot.slane %v974_v59, 4 }
 0x35a   : > { %v969_v2 = vperm.slane %v965_v62, %v1605_v17 }
 0x35b   : > { %v996_v3 = vsel %vm304_vm1, %v980_v63, %v995_v1  ;;  %v993_v4 = vrot.slane %v980_v63, 4 }
 0x35c   : > { %v984_v5 = vsel %vm304_vm1, %v969_v2, %v983_v0  ;;  %v1004_v6 = vperm.slane %v996_v3, %v1615_v32  ;;  %v981_v7 = vrot.slane %v969_v2, 4 }
 0x35d   : > { %v992_v8 = vperm.slane %v984_v5, %v1615_v32  ;;  %v994_v9 = vsel %vm304_vm1, %v993_v4, %v974_v59 }
 0x35e   : > { %v1009_v10 = vrot.slane %v1004_v6, 4  ;;  %v982_v11 = vsel %vm304_vm1, %v981_v7, %v963_v58  ;;  %v1000_v12 = vperm.slane %v994_v9, %v1615_v32 }
 0x35f   : > { %v1011_v13 = vrot.slane %v992_v8, 4  ;;  %v988_v17 = vperm.slane %v982_v11, %v1615_v32 }
 0x360   : > { %v1010_v14 = vsel %vm304_vm1, %v1009_v10, %v992_v8  ;;  %v1005_v15 = vrot.slane %v1000_v12, 4 }
 0x361   : > { %v1012_v16 = vsel %vm304_vm1, %v1004_v6, %v1011_v13  ;;  %1018 = vrot.lane.b32.xlu2 %v1010_v14, %s1454_s25  ;;  %v1007_v39 = vrot.slane %v988_v17, 4 }
 0x362   : > { %1022 = vrot.lane.b32.xlu0 %v1012_v16, %s1455_s12  ;;  %v1006_v18 = vsel %vm304_vm1, %v1005_v15, %v988_v17 }
 0x363   : > { %v1008_v19 = vsel %vm304_vm1, %v1000_v12, %v1007_v39 }
 0x364   : > { %1014 = vrot.lane.b32.xlu1 %v1008_v19, %s1456_s27 }
 0x3bb   : > { %v1019_v20 = vpop.permute.xlu2 %1018 }
 0x3d4   : > { %v1023_v22 = vpop.permute.xlu0 %1022 }
 0x3d6   : > { %v1015_v32 = vpop.permute.xlu1 %1014 }
 0x3d7   : > { %v1025_v21 = vsel %vm662_vm2, %v1006_v18, %v1015_v32 }
 0x3d8   : > { %v1027_v24 = vsel %vm1026_vm3, %v1025_v21, %v1019_v20 }
 0x3d9   : > { %v1029_v44 = vsel %vm1028_vm4, %v1027_v24, %v1023_v22 }
 0x3da   : > { %1030 = vst.msk [vmem:[%s256_s30] sm:$0xff] %vm269_vm0, %v1029_v44 }
 0x3db   : > { %1398 = shalt.err (!%p1395_p10)
}
 0x3dc   : > { %1184 = dma.vmem_to_hbm [thread:$0]  (%p1551_p4), %s1045_s5, 128, %s1047_s6, %s1032_s22  }
 0x3dd PF: > { %s1058_s14 = sand.u32 1, %s1429_s15   ;;  %p1864_p13 = scmp.ge.s32.totalorder %s1441_s18, 2 }
 0x3de   : > { %s1059_s12 = scalar_lea.sflag [#allocation4], %s1058_s14 }
 0x3df   : > { %p1198_p11 = pnand %p1864_p13, %p1555_p6 }
 0x3e1   : > { %p1199_p0 = pneg %p1198_p11 }
 0x3e3   : > { %1424 = dma.done.wait (%p1199_p0), %s1059_s12, 128  }
 0x3e4   : > { %1426 = vsyncadd (%p1199_p0), %s1059_s12, 4294967168  ;;  %p18_p2 = scmp.ge.s32.totalorder %s1525_s8, 4   ;;  %s1865_s15 = smov %s1433_s16 }
 0x3e5   : > { %s1866_s16 = smov %s1437_s17  ;;  %s1867_s17 = smov %s1536_s11 }
 0x3e6   : > { %s1868_s18 = smov %s1525_s8  ;;  %20 = sbr.rel (!%p18_p2) target bundleno = 6 (0x6), region = 92 }
 0x3eb   :  { %1065 = vsyncpa [#allocation3], 1 }
 0x3ec   :  { %1067 = vsyncpa [#allocation3 + $0x1], 1 }
 0x3ed   :  { %1068 = vsyncpa [#allocation6], 1 }
 0x3ee   :  { %1069 = vsyncpa [#allocation4], 1 }
 0x3ef   :  { %1071 = vsyncpa [#allocation4 + $0x1], 1 }

</bundles_post_ra>
